<compile_context>
chip_gen: v7x
topology: tpu7x:2x2x1
jax: 0.10.0
libtpu: 0.0.40
codegen_flags: <defaults>
</compile_context>

<pallas_src>
import jax
import jax.numpy as jnp
from jax import lax
from jax.experimental import pallas as pl
from jax.experimental.pallas import tpu as pltpu

IN_FEATURES = 256
OUT_FEATURES = 256


def _linear_kernel(x_ref, w_ref, o_ref):
    # x_ref: (tm, K)  activation row-tile
    # w_ref: (N, K)   full weight, PyTorch layout [out_features, in_features]
    # o_ref: (tm, N)  output row-tile (lane-dense, full-width stores)
    o_ref[...] = lax.dot_general(
        x_ref[...],
        w_ref[...],
        dimension_numbers=(((1,), (1,)), ((), ())),  # contract K of x with K of W -> x @ W.T
        preferred_element_type=jnp.float32,
    ).astype(o_ref.dtype)


def transfer_forward(x, weight, *, tm=1024, use_bf16=False):
    """y = x @ weight.T, matching nn.Linear(256, 256, bias=False).

    x:      (..., 256) float32
    weight: (256, 256) float32, stored [out_features, in_features] like PyTorch.
    tm:     row-tile size (rows of the flattened batch per grid step).
    use_bf16: cast operands to bf16 (f32 MXU accumulate) to halve HBM traffic on v6e/v7x.
    """
    orig_shape = x.shape
    K = orig_shape[-1]
    assert K == IN_FEATURES, f"expected last dim {IN_FEATURES}, got {K}"
    N = weight.shape[0]
    out_dtype = x.dtype

    M = 1
    for d in orig_shape[:-1]:
        M *= d
    x2d = x.reshape(M, K)

    if use_bf16:
        x2d = x2d.astype(jnp.bfloat16)
        weight = weight.astype(jnp.bfloat16)

    # Row tile: multiple of 8 (sublane), no larger than needed for small M.
    tm_eff = max(8, min(int(tm), ((M + 7) // 8) * 8))
    tm_eff = ((tm_eff + 7) // 8) * 8
    grid_m = pl.cdiv(M, tm_eff)

    itemsize = jnp.dtype(x2d.dtype).itemsize
    cost = pl.CostEstimate(
        flops=2 * M * K * N,
        transcendentals=0,
        bytes_accessed=(M * K + N * K) * itemsize + M * N * jnp.dtype(out_dtype).itemsize,
    )

    out = pl.pallas_call(
        _linear_kernel,
        out_shape=jax.ShapeDtypeStruct((M, N), out_dtype),
        grid=(grid_m,),
        in_specs=[
            pl.BlockSpec((tm_eff, K), lambda i: (i, 0)),  # row-tile of activations
            pl.BlockSpec((N, K), lambda i: (0, 0)),       # full weight, resident every step
        ],
        out_specs=pl.BlockSpec((tm_eff, N), lambda i: (i, 0)),
        compiler_params=pltpu.CompilerParams(
            dimension_semantics=("parallel",),  # shards the M-grid across TCs (v7x megacore)
        ),
        cost_estimate=cost,
    )(x2d, weight)

    return out.reshape(*orig_shape[:-1], N)


if __name__ == "__main__":
    key = jax.random.PRNGKey(0)
    k_x, k_w = jax.random.split(key)

    # Small input consistent with the forward: (batch, seq, 256)
    batch, seq = 2, 8
    x = jax.random.normal(k_x, (batch, seq, IN_FEATURES), dtype=jnp.float32)

    # Deterministic weight init matching nn.Linear default scale:
    # kaiming-uniform -> U(-1/sqrt(in_features), 1/sqrt(in_features))
    bound = 1.0 / (IN_FEATURES ** 0.5)
    weight = jax.random.uniform(
        k_w, (OUT_FEATURES, IN_FEATURES), dtype=jnp.float32,
        minval=-bound, maxval=bound,
    )

    y = transfer_forward(x, weight)
    y = jax.block_until_ready(y)

    # Correctness check against plain-JAX reference of x @ W.T
    y_ref = jnp.einsum("bsk,nk->bsn", x, weight)
    assert y.shape == (batch, seq, OUT_FEATURES)
    assert jnp.allclose(y, y_ref, atol=1e-5, rtol=1e-5)

    print("KERNEL_OK")
</pallas_src>

<mosaic_0001>
module attributes {stable_mosaic.version = 11 : i64} {
  func.func @_linear_kernel(%arg0: i32, %arg1: memref<16x256xf32, #tpu.memory_space<vmem>>, %arg2: memref<256x256xf32, #tpu.memory_space<vmem>>, %arg3: memref<16x256xf32, #tpu.memory_space<vmem>>) attributes {dimension_semantics = [#tpu.dimension_semantics<parallel>], iteration_bounds = array<i64: 1>, scalar_prefetch = 0 : i64, scratch_operands = 0 : i64, tpu.core_type = #tpu.core_type<tc>, window_params = [{transform_indices = @transform_0, window_bounds = array<i64: 16, 256>}, {pipeline_mode = #tpu.pipeline_mode<synchronous>, transform_indices = @transform_1, window_bounds = array<i64: 256, 256>}, {transform_indices = @transform_2, window_bounds = array<i64: 16, 256>}]} {
    %c0 = arith.constant 0 : index
    %c0_0 = arith.constant 0 : index
    %0 = vector.load %arg1[%c0, %c0_0] : memref<16x256xf32, #tpu.memory_space<vmem>>, vector<16x256xf32>
    %c0_1 = arith.constant 0 : index
    %c0_2 = arith.constant 0 : index
    %1 = vector.load %arg2[%c0_1, %c0_2] : memref<256x256xf32, #tpu.memory_space<vmem>>, vector<256x256xf32>
    %cst = arith.constant dense<0.000000e+00> : vector<16x256xf32>
    %2 = tpu.matmul %0, %1, %cst {dimension_numbers = #tpu.dot_dimension_numbers<[1], [1], [0], [0], [0, 0, 1, 0], [], []>} : vector<16x256xf32>, vector<256x256xf32>, vector<16x256xf32> -> vector<16x256xf32>
    %c0_3 = arith.constant 0 : index
    %c0_4 = arith.constant 0 : index
    %3 = vector.load %arg3[%c0_3, %c0_4] : memref<16x256xf32, #tpu.memory_space<vmem>>, vector<16x256xf32>
    tpu.vector_store %arg3[%c0_3, %c0_4], %2 {strides = array<i32>} : memref<16x256xf32, #tpu.memory_space<vmem>>, vector<16x256xf32>,
    return
  }
  func.func @transform_0(%arg0: i32) -> (i32, i32) {
    %c0_i32 = arith.constant 0 : i32
    %c0_i32_0 = arith.constant 0 : i32
    return %arg0, %c0_i32 : i32, i32
  }
  func.func @transform_1(%arg0: i32) -> (i32, i32) {
    %c0_i32 = arith.constant 0 : i32
    %c0_i32_0 = arith.constant 0 : i32
    %c0_i32_1 = arith.constant 0 : i32
    return %c0_i32, %c0_i32_0 : i32, i32
  }
  func.func @transform_2(%arg0: i32) -> (i32, i32) {
    %c0_i32 = arith.constant 0 : i32
    %c0_i32_0 = arith.constant 0 : i32
    return %arg0, %c0_i32 : i32, i32
  }
}

</mosaic_0001>

<bundles_post_ra>
// kernel: tpu_custom_call.1
= control target key start
LH: loop header
LB: loop body
LE: loop exit
PB: predicated region body
PF: predicated region fallthrough
CT: control target
= control target key end

     0   :  { %7 = vsyncpa [#allocation3], 0  ;;  %s445_s0 = inlined_call_operand.hbm [shape: f32[16,256], index: 0, kind: input, shape index: {}]   ;;  %s446_s1 = inlined_call_operand.hbm [shape: f32[256,256], index: 1, kind: input, shape index: {}]   ;;  %s447_s2 = inlined_call_operand.hbm [shape: f32[16,256], index: 2, kind: output, shape index: {}]  }
   0x1   :  { %8 = vsyncpa [#allocation6], 0 }
   0x2   :  { %9 = vsyncpa [#allocation4], 0  ;;  %s380_s9 = smov [#allocation2]   ;;  %s308_s13 = scalar_lea.hbm %s445_s0, 512 }
   0x3   :  { %s15_s10 = sshll.u32 %s380_s9, 4  ;;  %p309_p0 = scmp.ne.s32.totalorder %s445_s0, %s308_s13  ;;  %s16_s10 = int_to_ptr.vmem [resolvable:$true] %s15_s10 }
   0x4   :  { %p312_p1 = scmp.lt.u32.totalorder %s308_s13, %s445_s0 }
   0x6   :  { %p314_p2 = pnand %p312_p1, %p309_p0 }
   0x8   :  { %317 = shalt.err (!%p314_p2)
}
   0x9   :  { %s318_s18 = scalar_lea.vmem %s16_s10, 512  ;;  %p323_p4 = scmp.lt.s32.totalorder %s16_s10, %s16_s10 }
   0xa   :  { %p319_p3 = scmp.ne.s32.totalorder %s16_s10, %s318_s18  ;;  %p324_p5 = scmp.lt.s32.totalorder %s318_s18, %s318_s18 }
   0xc   :  { %p325_p6 = por %p324_p5, %p323_p4 }
   0xe   :  { %p326_p7 = pnand %p325_p6, %p319_p3 }
  0x10   :  { %329 = shalt.err (!%p326_p7)
}
  0x11   :  { %s381_s19 = smov 256   ;;  %s382_s20 = smov 16  }
  0x12   :  { %21 = dma.hbm_to_vmem [thread:$0]  %s445_s0, 512, %s16_s10, [#allocation3], %s381_s19, %s381_s19, %s382_s20  }
  0x13   :  { %s383_s23 = smov [#allocation5]   ;;  %s330_s27 = scalar_lea.hbm %s446_s1, 8192 }
  0x14   :  { %s27_s24 = sshll.u32 %s383_s23, 4  ;;  %p331_p8 = scmp.ne.s32.totalorder %s446_s1, %s330_s27  ;;  %s28_s24 = int_to_ptr.vmem [resolvable:$true] %s27_s24 }
  0x15   :  { %p334_p9 = scmp.lt.u32.totalorder %s330_s27, %s446_s1 }
  0x17   :  { %p336_p10 = pnand %p334_p9, %p331_p8 }
  0x19   :  { %339 = shalt.err (!%p336_p10)
}
  0x1a   :  { %s340_s4 = scalar_lea.vmem %s28_s24, 8192  ;;  %p345_p12 = scmp.lt.s32.totalorder %s28_s24, %s28_s24 }
  0x1b   :  { %p341_p11 = scmp.ne.s32.totalorder %s28_s24, %s340_s4  ;;  %p346_p13 = scmp.lt.s32.totalorder %s340_s4, %s340_s4 }
  0x1d   :  { %p347_p0 = por %p346_p13, %p345_p12 }
  0x1f   :  { %p348_p1 = pnand %p347_p0, %p341_p11 }
  0x21   :  { %351 = shalt.err (!%p348_p1)
}
  0x22   :  { %33 = dma.hbm_to_vmem [thread:$0]  %s446_s1, 8192, %s28_s24, [#allocation6], %s381_s19, %s381_s19, %s382_s20  }
  0x23   :  { %374 = dma.done.wait [#allocation3], 512  }
  0x24   :  { %375 = vsyncadd [#allocation3], 4294966784 }
  0x25   :  { %376 = dma.done.wait [#allocation6], 8192  }
  0x26   :  { %377 = vsyncadd [#allocation6], 4294959104  ;;  %v45_v0 = vld [vmem:[#allocation5 + $0x8] sm:$0xff]  ;;  %v47_v1 = vld [vmem:[#allocation5 + $0x18] sm:$0xff]  ;;  %s384_s1 = smov [#allocation7]  }
  0x27   :  { %v44_v2 = vld [vmem:[#allocation5] sm:$0xff]  ;;  %v207_v3 = vpack.c.bf16 %v47_v1, %v45_v0  ;;  %v46_v4 = vld [vmem:[#allocation5 + $0x10] sm:$0xff]  ;;  %v49_v5 = vld [vmem:[#allocation5 + $0x28] sm:$0xff]  ;;  %s194_s6 = sshll.u32 %s384_s1, 4  ;;  %s195_s6 = int_to_ptr.vmem [resolvable:$true] %s194_s6 }
  0x28   :  { %v51_v6 = vld [vmem:[#allocation5 + $0x38] sm:$0xff]  ;;  %v209_v7 = vpack.c.bf16 %v46_v4, %v44_v2  ;;  %v48_v9 = vld [vmem:[#allocation5 + $0x20] sm:$0xff]  ;;  %v50_v10 = vld [vmem:[#allocation5 + $0x30] sm:$0xff]  ;;  %s352_s7 = scalar_lea.vmem %s195_s6, 512  ;;  %p357_p3 = scmp.lt.s32.totalorder %s195_s6, %s195_s6 }
  0x29   :  { %v211_v8 = vpack.c.bf16 %v51_v6, %v49_v5  ;;  %208 = vmatprep.subr.bf16.mxu0 %v207_v3  ;;  %271 = vmatprep.subr.bf16.mxu1 %v207_v3  ;;  %v53_v11 = vld [vmem:[#allocation5 + $0x48] sm:$0xff]  ;;  %v55_v12 = vld [vmem:[#allocation5 + $0x58] sm:$0xff]  ;;  %v213_v13 = vpack.c.bf16 %v50_v10, %v48_v9  ;;  %v52_v15 = vld [vmem:[#allocation5 + $0x40] sm:$0xff]  ;;  %p353_p2 = scmp.ne.s32.totalorder %s195_s6, %s352_s7  ;;  %p358_p4 = scmp.lt.s32.totalorder %s352_s7, %s352_s7 }
  0x2a   :  { %210 = vmatpush1.bf16.xpose.msra.mxu0 %v209_v7  ;;  %287 = vmatpush1.bf16.xpose.msra.mxu1 %v209_v7  ;;  %v215_v14 = vpack.c.bf16 %v55_v12, %v53_v11  ;;  %v54_v16 = vld [vmem:[#allocation5 + $0x50] sm:$0xff]  ;;  %v57_v17 = vld [vmem:[#allocation5 + $0x68] sm:$0xff]  ;;  %v59_v18 = vld [vmem:[#allocation5 + $0x78] sm:$0xff] }
  0x2b   :  { %212 = vmatprep.subr.bf16.mxu0 %v211_v8  ;;  %272 = vmatprep.subr.bf16.mxu1 %v211_v8  ;;  %v217_v19 = vpack.c.bf16 %v54_v16, %v52_v15  ;;  %v219_v20 = vpack.c.bf16 %v59_v18, %v57_v17  ;;  %v56_v21 = vld [vmem:[#allocation5 + $0x60] sm:$0xff]  ;;  %v58_v22 = vld [vmem:[#allocation5 + $0x70] sm:$0xff]  ;;  %v41_v23 = vld [vmem:[#allocation2 + $0x8] sm:$0xff]  ;;  %p359_p5 = por %p358_p4, %p357_p3 }
  0x2c   :  { %v43_v24 = vld [vmem:[#allocation2 + $0x18] sm:$0xff]  ;;  %v61_v25 = vld [vmem:[#allocation5 + $0x88] sm:$0xff]  ;;  %172 = vmatprep.mubr.f32.mxu0 %v41_v23  ;;  %v221_v27 = vpack.c.bf16 %v58_v22, %v56_v21  ;;  %v60_v29 = vld [vmem:[#allocation5 + $0x80] sm:$0xff] }
  0x2d   :  { %v63_v26 = vld [vmem:[#allocation5 + $0x98] sm:$0xff]  ;;  %178 = vmatprep.mubr.f32.mxu1 %v43_v24  ;;  %v62_v30 = vld [vmem:[#allocation5 + $0x90] sm:$0xff]  ;;  %v65_v31 = vld [vmem:[#allocation5 + $0xa8] sm:$0xff]  ;;  %p360_p6 = pnand %p359_p5, %p353_p2 }
  0x2e   :  { %v223_v28 = vpack.c.bf16 %v63_v26, %v61_v25  ;;  %v67_v32 = vld [vmem:[#allocation5 + $0xb8] sm:$0xff]  ;;  %v225_v33 = vpack.c.bf16 %v62_v30, %v60_v29  ;;  %v64_v35 = vld [vmem:[#allocation5 + $0xa0] sm:$0xff]  ;;  %v66_v36 = vld [vmem:[#allocation5 + $0xb0] sm:$0xff] }
  0x2f   :  { %v227_v34 = vpack.c.bf16 %v67_v32, %v65_v31  ;;  %v69_v37 = vld [vmem:[#allocation5 + $0xc8] sm:$0xff]  ;;  %v71_v38 = vld [vmem:[#allocation5 + $0xd8] sm:$0xff]  ;;  %v229_v39 = vpack.c.bf16 %v66_v36, %v64_v35  ;;  %v68_v41 = vld [vmem:[#allocation5 + $0xc0] sm:$0xff] }
  0x30   :  { %v231_v40 = vpack.c.bf16 %v71_v38, %v69_v37  ;;  %v70_v42 = vld [vmem:[#allocation5 + $0xd0] sm:$0xff]  ;;  %v73_v43 = vld [vmem:[#allocation5 + $0xe8] sm:$0xff]  ;;  %v75_v44 = vld [vmem:[#allocation5 + $0xf8] sm:$0xff] }
  0x31   :  { %v233_v45 = vpack.c.bf16 %v70_v42, %v68_v41  ;;  %v235_v46 = vpack.c.bf16 %v75_v44, %v73_v43  ;;  %v72_v47 = vld [vmem:[#allocation5 + $0xe0] sm:$0xff]  ;;  %v74_v48 = vld [vmem:[#allocation5 + $0xf0] sm:$0xff]  ;;  %v77_v49 = vld [vmem:[#allocation5 + $0x108] sm:$0xff] }
  0x32   :  { %214 = vmatpush1.bf16.xpose.msra.mxu0 %v213_v13  ;;  %288 = vmatpush1.bf16.xpose.msra.mxu1 %v213_v13  ;;  %v79_v50 = vld [vmem:[#allocation5 + $0x118] sm:$0xff]  ;;  %v237_v51 = vpack.c.bf16 %v74_v48, %v72_v47  ;;  %v76_v53 = vld [vmem:[#allocation5 + $0x100] sm:$0xff]  ;;  %v78_v54 = vld [vmem:[#allocation5 + $0x110] sm:$0xff] }
  0x33   :  { %216 = vmatprep.subr.bf16.mxu0 %v215_v14  ;;  %273 = vmatprep.subr.bf16.mxu1 %v215_v14  ;;  %v239_v52 = vpack.c.bf16 %v79_v50, %v77_v49  ;;  %v81_v55 = vld [vmem:[#allocation5 + $0x128] sm:$0xff]  ;;  %v83_v56 = vld [vmem:[#allocation5 + $0x138] sm:$0xff]  ;;  %v241_v57 = vpack.c.bf16 %v78_v54, %v76_v53  ;;  %v80_v59 = vld [vmem:[#allocation5 + $0x120] sm:$0xff] }
  0x34   :  { %v243_v58 = vpack.c.bf16 %v83_v56, %v81_v55  ;;  %v82_v60 = vld [vmem:[#allocation5 + $0x130] sm:$0xff]  ;;  %v85_v61 = vld [vmem:[#allocation5 + $0x148] sm:$0xff]  ;;  %v87_v62 = vld [vmem:[#allocation5 + $0x158] sm:$0xff] }
  0x35   :  { %v245_v63 = vpack.c.bf16 %v82_v60, %v80_v59  ;;  %v247_v0 = vpack.c.bf16 %v87_v62, %v85_v61  ;;  %v84_v1 = vld [vmem:[#allocation5 + $0x140] sm:$0xff]  ;;  %v86_v2 = vld [vmem:[#allocation5 + $0x150] sm:$0xff]  ;;  %v89_v3 = vld [vmem:[#allocation5 + $0x168] sm:$0xff] }
  0x36   :  { %v91_v4 = vld [vmem:[#allocation5 + $0x178] sm:$0xff]  ;;  %v249_v5 = vpack.c.bf16 %v86_v2, %v84_v1  ;;  %v88_v7 = vld [vmem:[#allocation5 + $0x160] sm:$0xff]  ;;  %v90_v8 = vld [vmem:[#allocation5 + $0x170] sm:$0xff] }
  0x37   :  { %v251_v6 = vpack.c.bf16 %v91_v4, %v89_v3  ;;  %v93_v9 = vld [vmem:[#allocation5 + $0x188] sm:$0xff]  ;;  %v95_v10 = vld [vmem:[#allocation5 + $0x198] sm:$0xff]  ;;  %v253_v11 = vpack.c.bf16 %v90_v8, %v88_v7  ;;  %v92_v13 = vld [vmem:[#allocation5 + $0x180] sm:$0xff] }
  0x38   :  { %v255_v12 = vpack.c.bf16 %v95_v10, %v93_v9  ;;  %v94_v14 = vld [vmem:[#allocation5 + $0x190] sm:$0xff]  ;;  %v97_v15 = vld [vmem:[#allocation5 + $0x1a8] sm:$0xff]  ;;  %v99_v16 = vld [vmem:[#allocation5 + $0x1b8] sm:$0xff] }
  0x39   :  { %v257_v17 = vpack.c.bf16 %v94_v14, %v92_v13  ;;  %v259_v18 = vpack.c.bf16 %v99_v16, %v97_v15  ;;  %v101_v21 = vld [vmem:[#allocation5 + $0x1c8] sm:$0xff]  ;;  %v103_v22 = vld [vmem:[#allocation5 + $0x1d8] sm:$0xff]  ;;  %v100_v25 = vld [vmem:[#allocation5 + $0x1c0] sm:$0xff] }
  0x3a   :  { %218 = vmatpush1.bf16.xpose.msra.mxu0 %v217_v19  ;;  %289 = vmatpush1.bf16.xpose.msra.mxu1 %v217_v19  ;;  %v96_v19 = vld [vmem:[#allocation5 + $0x1a0] sm:$0xff]  ;;  %v263_v24 = vpack.c.bf16 %v103_v22, %v101_v21  ;;  %v102_v26 = vld [vmem:[#allocation5 + $0x1d0] sm:$0xff] }
  0x3b   :  { %220 = vmatprep.subr.bf16.mxu0 %v219_v20  ;;  %274 = vmatprep.subr.bf16.mxu1 %v219_v20  ;;  %v98_v20 = vld [vmem:[#allocation5 + $0x1b0] sm:$0xff]  ;;  %v265_v29 = vpack.c.bf16 %v102_v26, %v100_v25  ;;  %v104_v31 = vld [vmem:[#allocation5 + $0x1e0] sm:$0xff] }
  0x3c   :  { %v261_v23 = vpack.c.bf16 %v98_v20, %v96_v19  ;;  %v106_v32 = vld [vmem:[#allocation5 + $0x1f0] sm:$0xff] }
  0x3d   :  { %v42_v35 = vld [vmem:[#allocation2 + $0x10] sm:$0xff] }
  0x42   :  { %222 = vmatpush1.bf16.xpose.msra.mxu0 %v221_v27  ;;  %290 = vmatpush1.bf16.xpose.msra.mxu1 %v221_v27  ;;  %v105_v27 = vld [vmem:[#allocation5 + $0x1e8] sm:$0xff] }
  0x43   :  { %224 = vmatprep.subr.bf16.mxu0 %v223_v28  ;;  %275 = vmatprep.subr.bf16.mxu1 %v223_v28  ;;  %v107_v28 = vld [vmem:[#allocation5 + $0x1f8] sm:$0xff] }
  0x44   :  { %v267_v30 = vpack.c.bf16 %v107_v28, %v105_v27 }
  0x4a   :  { %226 = vmatpush1.bf16.xpose.msra.mxu0 %v225_v33  ;;  %291 = vmatpush1.bf16.xpose.msra.mxu1 %v225_v33  ;;  %v269_v33 = vpack.c.bf16 %v106_v32, %v104_v31 }
  0x4b   :  { %228 = vmatprep.subr.bf16.mxu0 %v227_v34  ;;  %276 = vmatprep.subr.bf16.mxu1 %v227_v34  ;;  %v40_v34 = vld [vmem:[#allocation2] sm:$0xff] }
  0x52   :  { %230 = vmatpush1.bf16.xpose.msra.mxu0 %v229_v39  ;;  %292 = vmatpush1.bf16.xpose.msra.mxu1 %v229_v39 }
  0x53   :  { %232 = vmatprep.subr.bf16.mxu0 %v231_v40  ;;  %277 = vmatprep.subr.bf16.mxu1 %v231_v40 }
  0x5a   :  { %234 = vmatpush1.bf16.xpose.msra.mxu0 %v233_v45  ;;  %293 = vmatpush1.bf16.xpose.msra.mxu1 %v233_v45 }
  0x5b   :  { %236 = vmatprep.subr.bf16.mxu0 %v235_v46  ;;  %278 = vmatprep.subr.bf16.mxu1 %v235_v46 }
  0x62   :  { %238 = vmatpush1.bf16.xpose.msra.mxu0 %v237_v51  ;;  %294 = vmatpush1.bf16.xpose.msra.mxu1 %v237_v51 }
  0x63   :  { %240 = vmatprep.subr.bf16.mxu0 %v239_v52  ;;  %279 = vmatprep.subr.bf16.mxu1 %v239_v52 }
  0x6a   :  { %242 = vmatpush1.bf16.xpose.msra.mxu0 %v241_v57  ;;  %295 = vmatpush1.bf16.xpose.msra.mxu1 %v241_v57 }
  0x6b   :  { %244 = vmatprep.subr.bf16.mxu0 %v243_v58  ;;  %280 = vmatprep.subr.bf16.mxu1 %v243_v58 }
  0x72   :  { %246 = vmatpush1.bf16.xpose.msra.mxu0 %v245_v63  ;;  %296 = vmatpush1.bf16.xpose.msra.mxu1 %v245_v63 }
  0x73   :  { %248 = vmatprep.subr.bf16.mxu0 %v247_v0  ;;  %281 = vmatprep.subr.bf16.mxu1 %v247_v0 }
  0x7a   :  { %250 = vmatpush1.bf16.xpose.msra.mxu0 %v249_v5  ;;  %297 = vmatpush1.bf16.xpose.msra.mxu1 %v249_v5 }
  0x7b   :  { %252 = vmatprep.subr.bf16.mxu0 %v251_v6  ;;  %282 = vmatprep.subr.bf16.mxu1 %v251_v6 }
  0x82   :  { %254 = vmatpush1.bf16.xpose.msra.mxu0 %v253_v11  ;;  %298 = vmatpush1.bf16.xpose.msra.mxu1 %v253_v11 }
  0x83   :  { %256 = vmatprep.subr.bf16.mxu0 %v255_v12  ;;  %283 = vmatprep.subr.bf16.mxu1 %v255_v12 }
  0x8a   :  { %258 = vmatpush1.bf16.xpose.msra.mxu0 %v257_v17  ;;  %299 = vmatpush1.bf16.xpose.msra.mxu1 %v257_v17 }
  0x8b   :  { %260 = vmatprep.subr.bf16.mxu0 %v259_v18  ;;  %284 = vmatprep.subr.bf16.mxu1 %v259_v18 }
  0x92   :  { %262 = vmatpush1.bf16.xpose.msra.mxu0 %v261_v23  ;;  %300 = vmatpush1.bf16.xpose.msra.mxu1 %v261_v23 }
  0x93   :  { %264 = vmatprep.subr.bf16.mxu0 %v263_v24  ;;  %285 = vmatprep.subr.bf16.mxu1 %v263_v24 }
  0x9a   :  { %266 = vmatpush1.bf16.xpose.msra.mxu0 %v265_v29  ;;  %301 = vmatpush1.bf16.xpose.msra.mxu1 %v265_v29 }
  0x9b   :  { %268 = vmatprep.subr.bf16.mxu0 %v267_v30  ;;  %286 = vmatprep.subr.bf16.mxu1 %v267_v30 }
  0xa2   :  { %270 = vmatpush1.bf16.xpose.msra.mxu0 %v269_v33  ;;  %302 = vmatpush1.bf16.xpose.msra.mxu1 %v269_v33 }
  0xa9   :  { %173 = vmatmul.mubr.f32.vlgmr.msra.gmra.mrb[0].mxu0 %v40_v34  ;;  %179 = vmatmul.mubr.f32.vlgmr.msra.gmra.mrb[0].mxu1 %v42_v35 }
 0x17c   :  { %v174_v36 = vpop.f32.mrb[0].mxu0  ;;  %v180_v37 = vpop.f32.mrb[0].mxu1 }
 0x17d   :  { %185 = vst [vmem:[#allocation7] sm:$0xff] %v174_v36  ;;  %187 = vst [vmem:[#allocation7 + $0x10] sm:$0xff] %v180_v37  ;;  %v176_v38 = vpop.f32.mrb[1].mxu0  ;;  %v182_v39 = vpop.f32.mrb[1].mxu1 }
 0x17e   :  { %186 = vst [vmem:[#allocation7 + $0x8] sm:$0xff] %v176_v38  ;;  %188 = vst [vmem:[#allocation7 + $0x18] sm:$0xff] %v182_v39 }
 0x17f   :  { %363 = shalt.err (!%p360_p6)
}
 0x180   :  { %s364_s10 = scalar_lea.hbm %s447_s2, 512 }
 0x181   :  { %p365_p7 = scmp.ne.s32.totalorder %s447_s2, %s364_s10  ;;  %p368_p8 = scmp.lt.u32.totalorder %s364_s10, %s447_s2 }
 0x183   :  { %p370_p9 = pnand %p368_p8, %p365_p7 }
 0x185   :  { %373 = shalt.err (!%p370_p9)
}
 0x186   :  { %200 = dma.vmem_to_hbm [thread:$0]  %s195_s6, 512, %s447_s2, [#allocation4], %s381_s19, %s381_s19, %s382_s20  }
 0x187   :  { %378 = dma.done.wait [#allocation4], 512  }
 0x188   :  { %379 = vsyncadd [#allocation4], 4294966784 }
 0x189   :  { %204 = vsyncpa [#allocation3], 1 }
 0x18a   :  { %205 = vsyncpa [#allocation6], 1 }
 0x18b   :  { %206 = vsyncpa [#allocation4], 1 }

</bundles_post_ra>
